<compile_context>
chip_gen: v5e
topology: v5e:2x2
jax: 0.10.0
libtpu: 0.0.40
codegen_flags: <defaults>
</compile_context>

<pallas_src>
import jax
import jax.numpy as jnp
from jax.experimental import pallas as pl
from jax.experimental.pallas import tpu as pltpu


# ----------------------------- Pallas kernel -------------------------------

def aggnet_kernel(xa_ref, xb_ref, w1_ref, b1_ref, wf_ref, bf_ref, o_ref):
    f32 = jnp.float32
    # In-kernel lane-dim concat of the two branch inputs (XLU work, overlaps
    # with MXU); avoids a wrapper-side HBM concat pass.
    x = jnp.concatenate([xa_ref[...], xb_ref[...]], axis=-1)        # [tb, 28] bf16
    h = jnp.dot(x, w1_ref[...], preferred_element_type=f32) + b1_ref[...]
    h = jnp.maximum(h, 0.0)                                         # ReLU in f32
    o_ref[...] = (
        jnp.dot(h.astype(jnp.bfloat16), wf_ref[...], preferred_element_type=f32)
        + bf_ref[...]
    )


# ------------------------------- wrapper ------------------------------------

def _round_up(x, m):
    return ((x + m - 1) // m) * m


def fuse_params(params):
    """One-time param prep.

    - Block-diagonal fusion of the two branch MLPs.
    - Fold the x2.0 pre_fn of branch "obs_b" into its first-layer weight.
    - Fuse the branch output layer with the final Linear (no nonlinearity
      in between):  Wf = W2 @ WL,  bf = b2 @ WL + bl.
    - Store matmul weights in bf16 (MXU-native); biases stay f32.
    """
    wa1, ba1 = params["wa1"], params["ba1"]          # 16 -> 32
    wa2, ba2 = params["wa2"], params["ba2"]          # 32 -> 24
    wb1, bb1 = params["wb1"], params["bb1"]          # 12 -> 32
    wb2, bb2 = params["wb2"], params["bb2"]          # 32 ->  8
    wl, bl = params["wl"], params["bl"]              # 32 -> 16

    ia, ha = wa1.shape           # (16, 32)
    ib, hb = wb1.shape           # (12, 32)
    oa = wa2.shape[1]            # 24
    ob = wb2.shape[1]            # 8

    # pre_fn for branch b is x * 2.0  ->  fold into its first-layer weight.
    wb1_scaled = wb1 * 2.0

    w1 = jnp.zeros((ia + ib, ha + hb), jnp.float32)
    w1 = w1.at[:ia, :ha].set(wa1)
    w1 = w1.at[ia:, ha:].set(wb1_scaled)
    b1 = jnp.concatenate([ba1, bb1], axis=-1)        # [1, 64] f32

    w2 = jnp.zeros((ha + hb, oa + ob), jnp.float32)
    w2 = w2.at[:ha, :oa].set(wa2)
    w2 = w2.at[ha:, oa:].set(wb2)
    b2 = jnp.concatenate([ba2, bb2], axis=-1)        # [1, 32] f32

    # Fuse second layer with the final linear (both in f32, then cast weight).
    wf = w2 @ wl                                     # [64, 16] f32
    bf = b2 @ wl + bl                                # [1, 16]  f32

    return dict(
        w1=w1.astype(jnp.bfloat16), b1=b1,
        wf=wf.astype(jnp.bfloat16), bf=bf,
    )


def _choose_batch_tile(B, tile_b):
    """Tile the batch so there are >=2 grid steps when the batch allows it
    (v7x megacore sharding + double-buffering); tiles are multiples of 16
    (bf16 sublane packing), capped at tile_b."""
    if B <= 16:
        return 16                                   # one (possibly partial) block
    return min(tile_b, _round_up((B + 1) // 2, 16))


def aggnet_forward(kv, fused, *, tile_b=2048):
    """kv: dict of branch inputs [B, in_dim]; fused: output of fuse_params()."""
    # TODO(synk): upstream producers should emit bf16 directly; this cast is an
    # extra XLA pass when the inputs arrive as f32.
    xa = kv["obs_a"].astype(jnp.bfloat16)
    xb = kv["obs_b"].astype(jnp.bfloat16)
    B = xa.shape[0]
    da, db = xa.shape[1], xb.shape[1]
    out_dim = fused["wf"].shape[1]

    tb = _choose_batch_tile(B, tile_b)
    grid = (pl.cdiv(B, tb),)        # trailing partial block handled by Pallas

    def const_spec(a):
        return pl.BlockSpec(a.shape, lambda i: (0, 0))

    out = pl.pallas_call(
        aggnet_kernel,
        out_shape=jax.ShapeDtypeStruct((B, out_dim), jnp.float32),
        grid=grid,
        in_specs=[
            pl.BlockSpec((tb, da), lambda i: (i, 0)),   # streamed obs_a tiles
            pl.BlockSpec((tb, db), lambda i: (i, 0)),   # streamed obs_b tiles
            const_spec(fused["w1"]), const_spec(fused["b1"]),   # VMEM-resident
            const_spec(fused["wf"]), const_spec(fused["bf"]),
        ],
        out_specs=pl.BlockSpec((tb, out_dim), lambda i: (i, 0)),
        compiler_params=pltpu.CompilerParams(
            dimension_semantics=("parallel",),
        ),
    )(xa, xb, fused["w1"], fused["b1"], fused["wf"], fused["bf"])

    return out


# ------------------------ deterministic parameter init ----------------------

def _linear_init(key, fan_in, fan_out):
    """PyTorch-style uniform(-1/sqrt(fan_in), 1/sqrt(fan_in)); W stored [in, out]."""
    kw, kb = jax.random.split(key)
    bound = 1.0 / jnp.sqrt(jnp.float32(fan_in))
    w = jax.random.uniform(kw, (fan_in, fan_out), jnp.float32, -bound, bound)
    b = jax.random.uniform(kb, (1, fan_out), jnp.float32, -bound, bound)
    return w, b


def make_params(key):
    ks = jax.random.split(key, 5)
    wa1, ba1 = _linear_init(ks[0], 16, 32)    # obs_a: 16 -> 32
    wa2, ba2 = _linear_init(ks[1], 32, 24)    # obs_a: 32 -> 24
    wb1, bb1 = _linear_init(ks[2], 12, 32)    # obs_b: 12 -> 32
    wb2, bb2 = _linear_init(ks[3], 32, 8)     # obs_b: 32 ->  8
    wl, bl = _linear_init(ks[4], 24 + 8, 16)  # final: 32 -> 16
    return dict(wa1=wa1, ba1=ba1, wa2=wa2, ba2=ba2,
                wb1=wb1, bb1=bb1, wb2=wb2, bb2=bb2,
                wl=wl, bl=bl)


# -------------------------- plain-JAX references -----------------------------

def aggnet_reference(kv, params):
    """Original module semantics in full f32."""
    xa = kv["obs_a"]
    ya = jnp.maximum(xa @ params["wa1"] + params["ba1"], 0.0) @ params["wa2"] + params["wa2"] * 0 @ params["wa2"] if False else \
         jnp.maximum(xa @ params["wa1"] + params["ba1"], 0.0) @ params["wa2"] + params["ba2"]
    xb = kv["obs_b"] * 2.0
    yb = jnp.maximum(xb @ params["wb1"] + params["bb1"], 0.0) @ params["wb2"] + params["bb2"]
    cat = jnp.concatenate([ya, yb], axis=-1)
    return cat @ params["wl"] + params["bl"]


def aggnet_fused_reference(kv, fused):
    """Pure-JAX replica of the kernel's fused bf16 computation (precision-matched)."""
    x = jnp.concatenate(
        [kv["obs_a"].astype(jnp.bfloat16), kv["obs_b"].astype(jnp.bfloat16)], axis=-1)
    h = jnp.dot(x, fused["w1"], preferred_element_type=jnp.float32) + fused["b1"]
    h = jnp.maximum(h, 0.0)
    return (jnp.dot(h.astype(jnp.bfloat16), fused["wf"],
                    preferred_element_type=jnp.float32) + fused["bf"])


# ---------------------------------- main -------------------------------------

if __name__ == "__main__":
    key = jax.random.PRNGKey(0)
    k_xa, k_xb, k_p = jax.random.split(key, 3)

    B = 8
    kv = {
        "obs_a": jax.random.normal(k_xa, (B, 16), jnp.float32),
        "obs_b": jax.random.normal(k_xb, (B, 12), jnp.float32),
    }
    params = make_params(k_p)
    fused = fuse_params(params)          # one-time prep, not per call

    out = aggnet_forward(kv, fused)
    out = jax.block_until_ready(out)
    assert out.shape == (B, 16), out.shape

    # Tight check against the precision-matched (bf16-fused) reference.
    ref_fused = aggnet_fused_reference(kv, fused)
    assert jnp.allclose(out, ref_fused, atol=1e-4, rtol=1e-4), \
        float(jnp.max(jnp.abs(out - ref_fused)))

    # Looser check against the original f32 module semantics (bf16 streaming).
    ref = aggnet_reference(kv, params)
    assert jnp.allclose(out, ref, atol=5e-2, rtol=5e-2), \
        float(jnp.max(jnp.abs(out - ref)))

    print("KERNEL_OK")
</pallas_src>

<mosaic_0001>
module attributes {stable_mosaic.version = 11 : i64} {
  func.func @aggnet_kernel(%arg0: i32, %arg1: memref<16x16xbf16, #tpu.memory_space<vmem>>, %arg2: memref<16x12xbf16, #tpu.memory_space<vmem>>, %arg3: memref<28x64xbf16, #tpu.memory_space<vmem>>, %arg4: memref<1x64xf32, #tpu.memory_space<vmem>>, %arg5: memref<64x16xbf16, #tpu.memory_space<vmem>>, %arg6: memref<1x16xf32, #tpu.memory_space<vmem>>, %arg7: memref<16x16xf32, #tpu.memory_space<vmem>>) attributes {dimension_semantics = [#tpu.dimension_semantics<parallel>], iteration_bounds = array<i64: 1>, scalar_prefetch = 0 : i64, scratch_operands = 0 : i64, tpu.core_type = #tpu.core_type<tc>, window_params = [{transform_indices = @transform_0, window_bounds = array<i64: 16, 16>}, {transform_indices = @transform_1, window_bounds = array<i64: 16, 12>}, {pipeline_mode = #tpu.pipeline_mode<synchronous>, transform_indices = @transform_2, window_bounds = array<i64: 28, 64>}, {pipeline_mode = #tpu.pipeline_mode<synchronous>, transform_indices = @transform_3, window_bounds = array<i64: 1, 64>}, {pipeline_mode = #tpu.pipeline_mode<synchronous>, transform_indices = @transform_4, window_bounds = array<i64: 64, 16>}, {pipeline_mode = #tpu.pipeline_mode<synchronous>, transform_indices = @transform_5, window_bounds = array<i64: 1, 16>}, {transform_indices = @transform_6, window_bounds = array<i64: 16, 16>}]} {
    %c0 = arith.constant 0 : index
    %c0_0 = arith.constant 0 : index
    %0 = vector.load %arg1[%c0, %c0_0] : memref<16x16xbf16, #tpu.memory_space<vmem>>, vector<16x16xbf16>
    %c0_1 = arith.constant 0 : index
    %c0_2 = arith.constant 0 : index
    %1 = vector.load %arg2[%c0_1, %c0_2] : memref<16x12xbf16, #tpu.memory_space<vmem>>, vector<16x12xbf16>
    %2 = tpu.concatenate %0, %1 in 1 : vector<16x16xbf16>, vector<16x12xbf16> -> vector<16x28xbf16>
    %c0_3 = arith.constant 0 : index
    %c0_4 = arith.constant 0 : index
    %3 = vector.load %arg3[%c0_3, %c0_4] : memref<28x64xbf16, #tpu.memory_space<vmem>>, vector<28x64xbf16>
    %cst = arith.constant dense<0.000000e+00> : vector<16x64xf32>
    %4 = tpu.matmul %2, %3, %cst {dimension_numbers = #tpu.dot_dimension_numbers<[1], [0], [0], [1], [0, 0, 1, 1], [], []>} : vector<16x28xbf16>, vector<28x64xbf16>, vector<16x64xf32> -> vector<16x64xf32>
    %c0_5 = arith.constant 0 : index
    %c0_6 = arith.constant 0 : index
    %5 = vector.load %arg4[%c0_5, %c0_6] : memref<1x64xf32, #tpu.memory_space<vmem>>, vector<1x64xf32>
    %6 = vector.broadcast %5 : vector<1x64xf32> to vector<16x64xf32>
    %7 = arith.addf %4, %6 : vector<16x64xf32>
    %cst_7 = arith.constant 0.000000e+00 : f32
    %8 = vector.broadcast %cst_7 : f32 to vector<16x64xf32>
    %9 = arith.maximumf %7, %8 : vector<16x64xf32>
    %10 = arith.truncf %9 : vector<16x64xf32> to vector<16x64xbf16>
    %c0_8 = arith.constant 0 : index
    %c0_9 = arith.constant 0 : index
    %11 = vector.load %arg5[%c0_8, %c0_9] : memref<64x16xbf16, #tpu.memory_space<vmem>>, vector<64x16xbf16>
    %cst_10 = arith.constant dense<0.000000e+00> : vector<16x16xf32>
    %12 = tpu.matmul %10, %11, %cst_10 {dimension_numbers = #tpu.dot_dimension_numbers<[1], [0], [0], [1], [0, 0, 1, 1], [], []>} : vector<16x64xbf16>, vector<64x16xbf16>, vector<16x16xf32> -> vector<16x16xf32>
    %c0_11 = arith.constant 0 : index
    %c0_12 = arith.constant 0 : index
    %13 = vector.load %arg6[%c0_11, %c0_12] : memref<1x16xf32, #tpu.memory_space<vmem>>, vector<1x16xf32>
    %14 = vector.broadcast %13 : vector<1x16xf32> to vector<16x16xf32>
    %15 = arith.addf %12, %14 : vector<16x16xf32>
    %c0_13 = arith.constant 0 : index
    %c0_14 = arith.constant 0 : index
    %16 = vector.load %arg7[%c0_13, %c0_14] : memref<16x16xf32, #tpu.memory_space<vmem>>, vector<16x16xf32>
    tpu.vector_store %arg7[%c0_13, %c0_14], %15 {strides = array<i32>} : memref<16x16xf32, #tpu.memory_space<vmem>>, vector<16x16xf32>,
    return
  }
  func.func @transform_0(%arg0: i32) -> (i32, i32) {
    %c0_i32 = arith.constant 0 : i32
    %c0_i32_0 = arith.constant 0 : i32
    return %arg0, %c0_i32 : i32, i32
  }
  func.func @transform_1(%arg0: i32) -> (i32, i32) {
    %c0_i32 = arith.constant 0 : i32
    %c0_i32_0 = arith.constant 0 : i32
    return %arg0, %c0_i32 : i32, i32
  }
  func.func @transform_2(%arg0: i32) -> (i32, i32) {
    %c0_i32 = arith.constant 0 : i32
    %c0_i32_0 = arith.constant 0 : i32
    %c0_i32_1 = arith.constant 0 : i32
    return %c0_i32, %c0_i32_0 : i32, i32
  }
  func.func @transform_3(%arg0: i32) -> (i32, i32) {
    %c0_i32 = arith.constant 0 : i32
    %c0_i32_0 = arith.constant 0 : i32
    %c0_i32_1 = arith.constant 0 : i32
    return %c0_i32, %c0_i32_0 : i32, i32
  }
  func.func @transform_4(%arg0: i32) -> (i32, i32) {
    %c0_i32 = arith.constant 0 : i32
    %c0_i32_0 = arith.constant 0 : i32
    %c0_i32_1 = arith.constant 0 : i32
    return %c0_i32, %c0_i32_0 : i32, i32
  }
  func.func @transform_5(%arg0: i32) -> (i32, i32) {
    %c0_i32 = arith.constant 0 : i32
    %c0_i32_0 = arith.constant 0 : i32
    %c0_i32_1 = arith.constant 0 : i32
    return %c0_i32, %c0_i32_0 : i32, i32
  }
  func.func @transform_6(%arg0: i32) -> (i32, i32) {
    %c0_i32 = arith.constant 0 : i32
    %c0_i32_0 = arith.constant 0 : i32
    return %arg0, %c0_i32 : i32, i32
  }
}

</mosaic_0001>

<bundles_post_ra>
// kernel: tpu_custom_call.1
= control target key start
LH: loop header
LB: loop body
LE: loop exit
PB: predicated region body
PF: predicated region fallthrough
CT: control target
= control target key end

     0   :  { %11 = vsyncpa [#allocation3], 0  ;;  %vm67_vm0 = vcmask 1045504   ;;  %s236_s27 = smov 16   ;;  %vm41_vm1 = vcmask 130048   ;;  %vm64_vm2 = vcmask 228352   ;;  %s314_s0 = inlined_call_operand.vmem [shape: bf16[8,16], index: 0, kind: input, shape index: {}]   ;;  %s315_s1 = inlined_call_operand.vmem [shape: bf16[8,12], index: 1, kind: input, shape index: {}]   ;;  %s316_s2 = inlined_call_operand.vmem [shape: bf16[28,64], index: 2, kind: input, shape index: {}]   ;;  %s317_s3 = inlined_call_operand.vmem [shape: f32[1,64], index: 3, kind: input, shape index: {}]   ;;  %s318_s4 = inlined_call_operand.vmem [shape: bf16[64,16], index: 4, kind: input, shape index: {}]   ;;  %s319_s5 = inlined_call_operand.vmem [shape: f32[1,16], index: 5, kind: input, shape index: {}]   ;;  %s320_s6 = inlined_call_operand.hbm [shape: f32[8,16], index: 6, kind: output, shape index: {}]  }
   0x1   :  { %v197_v0 = vld [vmem:[%s315_s1] sm:$0xff]  ;;  %v176_v1 = vld [vmem:[%s316_s2 + $0x8] sm:$0xf]  ;;  %v199_v2 = vld [vmem:[%s316_s2 + $0x8] sm:$0x30]  ;;  %vm124_vm3 = vcmask 523264  }
   0x2   :  { %39 = vrot.lane.b32.xlu0 %v197_v0, %s236_s27  ;;  %v177_v3 = vor.u32 %v199_v2, %v176_v1  ;;  %v198_v5 = vld [vmem:[%s316_s2] sm:$0xff]  ;;  %v203_v9 = vld [vmem:[%s318_s4 + $0x18] sm:$0xff]  ;;  %v202_v10 = vld [vmem:[%s318_s4 + $0x10] sm:$0xff] }
   0x3   :  { %v196_v6 = vld [vmem:[%s314_s0] sm:$0xff]  ;;  %132 = vmatpush.bf16.msra.mxu1 %v203_v9  ;;  %v201_v11 = vld [vmem:[%s318_s4 + $0x8] sm:$0xff] }
   0x4   :  { %v69_v4 = vsel %vm67_vm0, %v177_v3, 0  ;;  %v200_v12 = vld [vmem:[%s318_s4] sm:$0xff] }
   0x5   :  { %77 = vmatpush.bf16.msra.mxu0 %v69_v4  ;;  %v208_v14 = vld [vmem:[%s317_s3] ss:$0 sm:$0xff] }
   0x6   :  { %v209_v21 = vld [vmem:[%s319_s5] ss:$0 sm:$0xff] }
   0x7   :  { %133 = vmatpush.bf16.msra.mxu1 %v202_v10 }
   0x9   :  { %78 = vmatpush.bf16.msra.mxu0 %v198_v5 }
   0xb   :  { %134 = vmatpush.bf16.msra.mxu1 %v201_v11 }
   0xf   :  { %135 = vmatpush.bf16.msra.mxu1 %v200_v12 }
  0x74   :  { %v40_v7 = vpop.permute.xlu0 %39 }
  0x75   :  { %v44_v8 = vsel %vm41_vm1, %v196_v6, %v40_v7 }
  0x76   :  { %178 = vmatmul.msk.bf16.vlgmr.msra.gmra.mxu0 %vm64_vm2, %v44_v8 }
  0xf3   :  { %v80_v13 = vpop.f32.mrf.mxu0 }
  0xf4   :  { %v81_v15 = vadd.f32 %v208_v14, %v80_v13 }
  0xf6   :  { %v85_v18 = vmax.f32 %v81_v15, 0.0 }
  0xfb   :  { %v82_v16 = vpop.f32.mrf.mxu0 }
  0xfc   :  { %v83_v17 = vadd.f32 %v208_v14, %v82_v16 }
  0xfe   :  { %v86_v19 = vmax.f32 %v83_v17, 0.0 }
 0x100   :  { %v87_v20 = vpack.c.bf16 %v86_v19, %v85_v18 }
 0x102   :  { %195 = vmatmul.msk.bf16.vlgmr.msra.gmra.mxu1 %vm124_vm3, %v87_v20 }
 0x17f   :  { %v137_v22 = vpop.f32.mrf.mxu1 }
 0x180   :  { %v138_v23 = vadd.f32 %v209_v21, %v137_v22 }
 0x182   :  { %142 = vst.msk [vmem:[#allocation2] sm:$0xff] %vm41_vm1, %v138_v23 }
 0x187   :  { %v139_v24 = vpop.f32.mrf.mxu1 }
 0x188   :  { %v140_v25 = vadd.f32 %v209_v21, %v139_v24 }
 0x18a   :  { %143 = vst.msk [vmem:[#allocation2 + $0x8] sm:$0xff] %vm41_vm1, %v140_v25 }
 0x18b   :  { %147 = vsyncadd [#allocation3], 128  ;;  %s150_s17 = sshll.u32 %s320_s6, 4  ;;  %s237_s18 = smov [#allocation2]   ;;  %s151_s17 = int_to_ptr.hbm [resolvable:$true] %s150_s17 }
 0x18c   :  { %s148_s19 = sshll.u32 %s237_s18, 4  ;;  %s238_s20 = smov 128   ;;  %s149_s19 = int_to_ptr.vmem [resolvable:$true] %s148_s19 }
 0x18d   :  { %s239_s21 = smov 8  }
 0x18e   :  { %156 = dma.vmem_to_hbm [thread:$0]  %s149_s19, 128, %s151_s17, [#allocation3], %s238_s20, %s238_s20, %s239_s21  }
 0x18f   :  { %234 = dma.done.wait [#allocation3], 256  }
 0x190   :  { %235 = vsyncadd [#allocation3], 4294967040 }
 0x191   :  { %161 = vsyncpa [#allocation3], 1 }

</bundles_post_ra>
